<compile_context>
chip_gen: v7x
topology: tpu7x:2x2x1
jax: 0.10.0
libtpu: 0.0.40
codegen_flags: <defaults>
</compile_context>

<pallas_src>
import jax
import jax.numpy as jnp
from jax.experimental import pallas as pl
from jax.experimental.pallas import tpu as pltpu


def mlp_kernel(x_ref, w1_ref, b1_ref, w2_ref, b2_ref, o_ref):
    # fc1 on the MXU: (TB, D) @ (D, H) -> (TB, H), f32 accumulation.
    h = jnp.dot(x_ref[...], w1_ref[...], preferred_element_type=jnp.float32)
    # bias + ReLU on the VPU.
    h = jnp.maximum(h + b1_ref[...], 0.0)
    # fc2 (out_features == 1): VPU multiply against the (1, H) weight row and
    # an XLU lane reduction -- both units otherwise idle here.
    logit = jnp.sum(h * w2_ref[...], axis=-1, keepdims=True) + b2_ref[0, 0]
    # Sigmoid: exp on the EUP, approximate reciprocal (vrcp) on the EUP.
    out = pl.reciprocal(1.0 + jnp.exp(-logit), approx=True)
    o_ref[...] = out.astype(o_ref.dtype)


def _round_up(n, m):
    return ((n + m - 1) // m) * m


def _device_kind():
    try:
        return jax.devices()[0].device_kind.lower()
    except Exception:
        return ""


def _vmem_limit_bytes(tb, D, H, x_itemsize):
    """Explicit scoped-VMEM budget for the double-buffered pipeline."""
    lane = 128
    x_blk = tb * _round_up(D, lane) * x_itemsize      # (tb, D) lane-padded
    o_blk = tb * lane * 4                              # (tb, 1) lane-padded
    w_blk = _round_up(D, 8) * _round_up(H, lane) * 4 + 2 * 8 * lane * 4
    need = 2 * (x_blk + o_blk + w_blk)                 # 2 buffers per stream
    # 2x margin for compiler scratch; floor 16 MiB; cap 40 MiB so v7x's
    # 64 MiB physical VMEM keeps >= 35% headroom (v5e/v6e have 128 MiB).
    return int(min(40 * 2**20, max(16 * 2**20, 2 * need)))


def net_forward(x, w1, b1, w2, b2, *, tb=None):
    """Forward pass of Net.

    x:  (B, D) activations (f32, or bf16 if produced in bf16 upstream)
    w1: (D, H) fc1 weight, pre-transposed to (in, out)
    b1: (H,) or (1, H) fc1 bias
    w2: (H, 1) fc2 weight
    b2: scalar-like fc2 bias
    """
    B, D = x.shape
    H = w1.shape[1]
    kind = _device_kind()

    b1_row = b1.reshape(1, H).astype(jnp.float32)
    w2_row = w2.reshape(1, H).astype(jnp.float32)
    b2_s = b2.reshape(1, 1).astype(jnp.float32)

    # Only use bf16 on the MXU when x is already bf16 upstream; casting x in
    # the wrapper would be a separate XLA pass and a net HBM loss.
    if x.dtype == jnp.bfloat16:
        w1 = w1.astype(jnp.bfloat16)
        row_mult = 16          # bf16 sublane packing: (16, 128) tiles
    else:
        x = x.astype(jnp.float32)
        w1 = w1.astype(jnp.float32)
        row_mult = 8

    # Batch tile: big enough to amortize the ~0.35 us per-grid-step overhead.
    if tb is None:
        tb = 8192
    if "v7" in kind:
        tb = min(tb, 8192)     # 64 MiB physical VMEM on v7x with this layout
    tb = min(tb, _round_up(B, row_mult))
    tb = _round_up(tb, row_mult)

    grid = (pl.cdiv(B, tb),)   # partial last block: OOB output stores dropped
    vmem_limit = _vmem_limit_bytes(tb, D, H, x.dtype.itemsize)

    cost = pl.CostEstimate(
        flops=2 * B * D * H + 3 * B * H,
        transcendentals=2 * B,
        bytes_accessed=(B * D * x.dtype.itemsize            # x read
                        + B * 4                              # output write
                        + D * H * w1.dtype.itemsize          # w1
                        + (2 * H + 1) * 4),                  # b1, w2, b2
    )

    # Megacore: on v7x shard the batch grid across both TensorCores.
    if "v7" in kind:
        dim_sem = (pltpu.CORE_PARALLEL,)
    else:
        dim_sem = ("parallel",)

    def _run(sem):
        return pl.pallas_call(
            mlp_kernel,
            out_shape=jax.ShapeDtypeStruct((B, 1), jnp.float32),
            grid=grid,
            in_specs=[
                pl.BlockSpec((tb, D), lambda i: (i, 0)),   # x: streamed tiles
                pl.BlockSpec((D, H), lambda i: (0, 0)),    # w1: VMEM-resident
                pl.BlockSpec((1, H), lambda i: (0, 0)),    # b1: VMEM-resident
                pl.BlockSpec((1, H), lambda i: (0, 0)),    # w2 row: resident
                pl.BlockSpec(memory_space=pltpu.MemorySpace.SMEM),  # b2 scalar
            ],
            out_specs=pl.BlockSpec((tb, 1), lambda i: (i, 0)),
            compiler_params=pltpu.CompilerParams(
                dimension_semantics=sem,
                vmem_limit_bytes=vmem_limit,
            ),
            cost_estimate=cost,
        )(x, w1, b1_row, w2_row, b2_s)

    try:
        return _run(dim_sem)
    except Exception:
        if dim_sem == ("parallel",):
            raise
        # Fallback if CORE_PARALLEL is not supported by the local toolchain.
        return _run(("parallel",))


def _reference(x, w1, b1, w2, b2):
    return jax.nn.sigmoid(jnp.maximum(x @ w1 + b1.reshape(1, -1), 0.0) @ w2
                          + b2.reshape(1, 1))


if __name__ == "__main__":
    # Small shapes consistent with the module: wine features = 13, hidden = 32.
    input_size = 13
    hidden_size = 32

    key = jax.random.PRNGKey(0)
    kx, k1, k2, k3, k4, kx2 = jax.random.split(key, 6)

    bound1 = 1.0 / (input_size ** 0.5)
    bound2 = 1.0 / (hidden_size ** 0.5)
    w1 = jax.random.uniform(k1, (input_size, hidden_size), jnp.float32,
                            -bound1, bound1)
    b1 = jax.random.uniform(k2, (1, hidden_size), jnp.float32, -bound1, bound1)
    w2 = jax.random.uniform(k3, (hidden_size, 1), jnp.float32, -bound2, bound2)
    b2 = jax.random.uniform(k4, (1, 1), jnp.float32, -bound2, bound2)

    # Check 1: tiny batch, single (exact) tile.
    batch = 8
    x = jax.random.normal(kx, (batch, input_size), dtype=jnp.float32)
    out = net_forward(x, w1, b1, w2, b2)
    jax.block_until_ready(out)
    ref = _reference(x, w1, b1, w2, b2)
    assert out.shape == (batch, 1)
    # approx=True reciprocal -> ~1e-3 relative error on the sigmoid output.
    assert jnp.allclose(out, ref, atol=2e-3, rtol=2e-3), "mismatch vs reference"

    # Check 2: exercise the cdiv grid + masked partial last block
    # (tb=8 -> 3 tiles, last tile has 4 valid rows).
    batch2 = 20
    x2 = jax.random.normal(kx2, (batch2, input_size), dtype=jnp.float32)
    out2 = net_forward(x2, w1, b1, w2, b2, tb=8)
    jax.block_until_ready(out2)
    ref2 = _reference(x2, w1, b1, w2, b2)
    assert out2.shape == (batch2, 1)
    assert jnp.allclose(out2, ref2, atol=2e-3, rtol=2e-3), "grid-path mismatch"

    print("KERNEL_OK")
</pallas_src>

<mosaic_0001>
module attributes {stable_mosaic.version = 11 : i64} {
  func.func @mlp_kernel(%arg0: i32, %arg1: memref<8x13xf32, #tpu.memory_space<vmem>>, %arg2: memref<13x32xf32, #tpu.memory_space<vmem>>, %arg3: memref<1x32xf32, #tpu.memory_space<vmem>>, %arg4: memref<1x32xf32, #tpu.memory_space<vmem>>, %arg5: memref<1x1xf32, #tpu.memory_space<smem>>, %arg6: memref<8x1xf32, #tpu.memory_space<vmem>>) attributes {dimension_semantics = [#tpu.dimension_semantics<parallel>], iteration_bounds = array<i64: 1>, scalar_prefetch = 0 : i64, scratch_operands = 0 : i64, tpu.core_type = #tpu.core_type<tc>, window_params = [{transform_indices = @transform_0, window_bounds = array<i64: 8, 13>}, {pipeline_mode = #tpu.pipeline_mode<synchronous>, transform_indices = @transform_1, window_bounds = array<i64: 13, 32>}, {pipeline_mode = #tpu.pipeline_mode<synchronous>, transform_indices = @transform_2, window_bounds = array<i64: 1, 32>}, {pipeline_mode = #tpu.pipeline_mode<synchronous>, transform_indices = @transform_3, window_bounds = array<i64: 1, 32>}, {transform_indices = @transform_4, window_bounds = array<i64: 1, 1>}, {transform_indices = @transform_5, window_bounds = array<i64: 8, 1>}]} {
    %c0 = arith.constant 0 : index
    %c0_0 = arith.constant 0 : index
    %0 = vector.load %arg1[%c0, %c0_0] : memref<8x13xf32, #tpu.memory_space<vmem>>, vector<8x13xf32>
    %c0_1 = arith.constant 0 : index
    %c0_2 = arith.constant 0 : index
    %1 = vector.load %arg2[%c0_1, %c0_2] : memref<13x32xf32, #tpu.memory_space<vmem>>, vector<13x32xf32>
    %cst = arith.constant dense<0.000000e+00> : vector<8x32xf32>
    %2 = tpu.matmul %0, %1, %cst {dimension_numbers = #tpu.dot_dimension_numbers<[1], [0], [0], [1], [0, 0, 1, 1], [], []>} : vector<8x13xf32>, vector<13x32xf32>, vector<8x32xf32> -> vector<8x32xf32>
    %c0_3 = arith.constant 0 : index
    %c0_4 = arith.constant 0 : index
    %3 = vector.load %arg3[%c0_3, %c0_4] : memref<1x32xf32, #tpu.memory_space<vmem>>, vector<1x32xf32>
    %4 = vector.broadcast %3 : vector<1x32xf32> to vector<8x32xf32>
    %5 = arith.addf %2, %4 : vector<8x32xf32>
    %cst_5 = arith.constant 0.000000e+00 : f32
    %6 = vector.broadcast %cst_5 : f32 to vector<8x32xf32>
    %7 = arith.maximumf %5, %6 : vector<8x32xf32>
    %c0_6 = arith.constant 0 : index
    %c0_7 = arith.constant 0 : index
    %8 = vector.load %arg4[%c0_6, %c0_7] : memref<1x32xf32, #tpu.memory_space<vmem>>, vector<1x32xf32>
    %9 = vector.broadcast %8 : vector<1x32xf32> to vector<8x32xf32>
    %10 = arith.mulf %7, %9 : vector<8x32xf32>
    %cst_8 = arith.constant dense<0.000000e+00> : vector<8xf32>
    %11 = vector.multi_reduction <add>, %10, %cst_8 [1] : vector<8x32xf32> to vector<8xf32>
    %12 = vector.shape_cast %11 : vector<8xf32> to vector<8x1xf32>
    %c0_9 = arith.constant 0 : index
    %c0_10 = arith.constant 0 : index
    %13 = memref.load %arg5[%c0_9, %c0_10] : memref<1x1xf32, #tpu.memory_space<smem>>
    %14 = vector.broadcast %13 : f32 to vector<8x1xf32>
    %15 = arith.addf %12, %14 : vector<8x1xf32>
    %cst_11 = arith.constant 0.000000e+00 : f32
    %16 = vector.broadcast %cst_11 : f32 to vector<8x1xf32>
    %17 = arith.subf %16, %15 : vector<8x1xf32>
    %18 = math.exp %17 : vector<8x1xf32>
    %cst_12 = arith.constant 1.000000e+00 : f32
    %19 = vector.broadcast %cst_12 : f32 to vector<8x1xf32>
    %20 = arith.addf %19, %18 : vector<8x1xf32>
    %21 = tpu.reciprocal %20 {approx = true} : vector<8x1xf32> -> vector<8x1xf32>
    %c0_13 = arith.constant 0 : index
    %c0_14 = arith.constant 0 : index
    %22 = vector.load %arg6[%c0_13, %c0_14] : memref<8x1xf32, #tpu.memory_space<vmem>>, vector<8x1xf32>
    tpu.vector_store %arg6[%c0_13, %c0_14], %21 {strides = array<i32>} : memref<8x1xf32, #tpu.memory_space<vmem>>, vector<8x1xf32>,
    return
  }
  func.func @transform_0(%arg0: i32) -> (i32, i32) {
    %c0_i32 = arith.constant 0 : i32
    %c0_i32_0 = arith.constant 0 : i32
    return %arg0, %c0_i32 : i32, i32
  }
  func.func @transform_1(%arg0: i32) -> (i32, i32) {
    %c0_i32 = arith.constant 0 : i32
    %c0_i32_0 = arith.constant 0 : i32
    %c0_i32_1 = arith.constant 0 : i32
    return %c0_i32, %c0_i32_0 : i32, i32
  }
  func.func @transform_2(%arg0: i32) -> (i32, i32) {
    %c0_i32 = arith.constant 0 : i32
    %c0_i32_0 = arith.constant 0 : i32
    %c0_i32_1 = arith.constant 0 : i32
    return %c0_i32, %c0_i32_0 : i32, i32
  }
  func.func @transform_3(%arg0: i32) -> (i32, i32) {
    %c0_i32 = arith.constant 0 : i32
    %c0_i32_0 = arith.constant 0 : i32
    %c0_i32_1 = arith.constant 0 : i32
    return %c0_i32, %c0_i32_0 : i32, i32
  }
  func.func @transform_4(%arg0: i32) -> (i32, i32) {
    %c0_i32 = arith.constant 0 : i32
    %c0_i32_0 = arith.constant 0 : i32
    %c0_i32_1 = arith.constant 0 : i32
    return %c0_i32, %c0_i32_0 : i32, i32
  }
  func.func @transform_5(%arg0: i32) -> (i32, i32) {
    %c0_i32 = arith.constant 0 : i32
    %c0_i32_0 = arith.constant 0 : i32
    return %arg0, %c0_i32 : i32, i32
  }
}

</mosaic_0001>

<bundles_post_ra>
// kernel: tpu_custom_call.1
= control target key start
LH: loop header
LB: loop body
LE: loop exit
PB: predicated region body
PF: predicated region fallthrough
CT: control target
= control target key end

     0   :  { %11 = vsyncpa [#allocation4], 0  ;;  %s323_s0 = inlined_call_operand.hbm [shape: f32[8,13], index: 0, kind: input, shape index: {}]   ;;  %s324_s1 = inlined_call_operand.hbm [shape: f32[13,32], index: 1, kind: input, shape index: {}]   ;;  %s325_s2 = inlined_call_operand.vmem [shape: f32[1,32], index: 2, kind: input, shape index: {}]   ;;  %s326_s3 = inlined_call_operand.vmem [shape: f32[1,32], index: 3, kind: input, shape index: {}]   ;;  %s327_s4 = inlined_call_operand.<no memory space> [shape: f32[1,1], index: 4, kind: input, shape index: {}]   ;;  %s328_s5 = inlined_call_operand.vmem [shape: f32[8,1], index: 5, kind: output, shape index: {}]  }
   0x1   :  { %12 = vsyncpa [#allocation6], 0  ;;  %s242_s18 = smov [#allocation3]   ;;  %s243_s20 = smov [#allocation5]  }
   0x2   :  { %s19_s19 = sshll.u32 %s242_s18, 4  ;;  %s28_s21 = sshll.u32 %s243_s20, 4  ;;  %s20_s19 = int_to_ptr.vmem [resolvable:$true] %s19_s19  ;;  %s280_s21 = int_to_ptr.vmem [resolvable:$true] %s28_s21 }
   0x3   :  { %s194_s24 = scalar_lea.hbm %s323_s0, 128 }
   0x4   :  { %p195_p0 = scmp.ne.s32.totalorder %s323_s0, %s194_s24  ;;  %p198_p1 = scmp.lt.u32.totalorder %s194_s24, %s323_s0 }
   0x6   :  { %p200_p2 = pnand %p198_p1, %p195_p0 }
   0x8   :  { %203 = shalt.err (!%p200_p2)
}
   0x9   :  { %s204_s29 = scalar_lea.vmem %s20_s19, 128  ;;  %p209_p4 = scmp.lt.s32.totalorder %s20_s19, %s20_s19 }
   0xa   :  { %p205_p3 = scmp.ne.s32.totalorder %s20_s19, %s204_s29  ;;  %p210_p5 = scmp.lt.s32.totalorder %s204_s29, %s204_s29 }
   0xc   :  { %p211_p6 = por %p210_p5, %p209_p4 }
   0xe   :  { %p212_p7 = pnand %p211_p6, %p205_p3 }
  0x10   :  { %215 = shalt.err (!%p212_p7)
}
  0x11   :  { %22 = dma.hbm_to_vmem [thread:$0]  %s323_s0, 128, %s20_s19, [#allocation4]  }
  0x12   :  { %s216_s9 = scalar_lea.hbm %s324_s1, 256 }
  0x13   :  { %p217_p8 = scmp.ne.s32.totalorder %s324_s1, %s216_s9  ;;  %p220_p9 = scmp.lt.u32.totalorder %s216_s9, %s324_s1 }
  0x15   :  { %p222_p10 = pnand %p220_p9, %p217_p8 }
  0x17   :  { %225 = shalt.err (!%p222_p10)
}
  0x18   :  { %s226_s14 = scalar_lea.vmem %s280_s21, 256  ;;  %p231_p12 = scmp.lt.s32.totalorder %s280_s21, %s280_s21 }
  0x19   :  { %p227_p11 = scmp.ne.s32.totalorder %s280_s21, %s226_s14  ;;  %p232_p13 = scmp.lt.s32.totalorder %s226_s14, %s226_s14 }
  0x1b   :  { %p233_p0 = por %p232_p13, %p231_p12 }
  0x1d   :  { %p234_p1 = pnand %p233_p0, %p227_p11 }
  0x1f   :  { %237 = shalt.err (!%p234_p1)
}
  0x20   :  { %s244_s0 = smov 128   ;;  %s245_s15 = smov 8  }
  0x21   :  { %34 = dma.hbm_to_vmem [thread:$0]  %s324_s1, 256, %s280_s21, [#allocation6], %s244_s0, %s244_s0, %s245_s15  }
  0x22   :  { %238 = dma.done.wait [#allocation4], 128  }
  0x23   :  { %239 = vsyncadd [#allocation4], 4294967168 }
  0x24   :  { %240 = dma.done.wait [#allocation6], 256  }
  0x25   :  { %241 = vsyncadd [#allocation6], 4294967040  ;;  %v246_v0 = vmov 0.0|0.0   ;;  %vm247_vm0 = vmmov 0   ;;  %v248_v1 = vmov 0.0   ;;  %vm61_vm1 = vcmask 1044480  }
  0x26   :  { %178 = vmatprep.subr.bf16.mxu0 %v246_v0  ;;  %175 = vmatprep.mubr.msk.f32.mxu0 %vm247_vm0, %v248_v1  ;;  %v48_v2 = vld [vmem:[#allocation5] sm:$0xff]  ;;  %v49_v3 = vld [vmem:[#allocation5 + $0x8] sm:$0x1f]  ;;  %vm249_vm2 = vmmov 1   ;;  %v47_v5 = vld [vmem:[#allocation3] sm:$0xff]  ;;  %vm57_vm4 = vcmask 105472   ;;  %v149_v14 = vstv %s327_s4 }
  0x27   :  { %vm180_vm3 = vmpackc.low %vm61_vm1, %vm249_vm2  ;;  %v179_v4 = vpack.c.bf16 %v49_v3, %v48_v2  ;;  %v164_v6 = vld [vmem:[%s325_s2] ss:$0 sm:$0xff]  ;;  %vm144_vm5 = vcmask 261120   ;;  %vm156_vm6 = vcmask 7168  }
  0x28   :  { %v167_v10 = vld [vmem:[%s326_s3] ss:$0 sm:$0xff] }
  0x29   :  { %181 = vmatpush3.bf16.msk.msra.mxu0 %vm180_vm3, %v179_v4 }
  0x2c   :  { %176 = vmatmul.mubr.msk.f32.vlgmr.msra.gmra.mrb[0].mxu0 %vm57_vm4, %v47_v5 }
  0xff   :  { %v131_v7 = vpop.f32.mrb[0].mxu0 }
 0x100   :  { %v132_v8 = vadd.f32 %v164_v6, %v131_v7  ;;  %v177_v9 = vpop.f32.mrb[1].mxu0 }
 0x102   :  { %v135_v11 = vmax.f32 %v132_v8, 0.0 }
 0x104   :  { %v143_v12 = vmul.f32 %v167_v10, %v135_v11 }
 0x106   :  { %v145_v13 = vsel %vm144_vm5, %v143_v12, 0.0 }
 0x107   :  { %146 = vadd.xlane.f32.xlu0 %v145_v13 }
 0x194   :  { %v147_v15 = vpop.xlane.xlu0 %146 }
 0x195   :  { %v150_v16 = vadd.f32 %v149_v14, %v147_v15 }
 0x197   :  { %v151_v17 = vsub.f32 0.0, %v150_v16 }
 0x199   :  { %v152_v18 = vmul.f32 1.442695, %v151_v17 }
 0x19b   :  { %190 = vpow2.f32 %v152_v18 }
 0x1a5   :  { %v191_v19 = vpop.eup %190 }
 0x1a6   :  { %v154_v20 = vadd.f32 1.0, %v191_v19 }
 0x1a8   :  { %192 = vrcp.f32 %v154_v20 }
 0x1b2   :  { %v193_v21 = vpop.eup %192 }
 0x1b3   :  { %157 = vst.msk [vmem:[%s328_s5] sm:$0xff] %vm156_vm6, %v193_v21 }
 0x1b4   :  { %162 = vsyncpa [#allocation4], 1 }
 0x1b5   :  { %163 = vsyncpa [#allocation6], 1 }

</bundles_post_ra>
